<compile_context>
chip_gen: v6e
topology: v6e:2x2x1
jax: 0.10.0
libtpu: 0.0.40
codegen_flags: <defaults>
</compile_context>

<pallas_src>
import jax
import jax.numpy as jnp
from jax.experimental import pallas as pl
from jax.experimental.pallas import tpu as pltpu


def policy_mlp_kernel(x_ref, w1_ref, b1_ref, w2_ref, b2_ref, w3_ref, b3_ref,
                      out_ref):
    # Layout: features on sublanes, batch on lanes.
    #   x_ref  : (in, TB)   bf16
    #   w*_ref : (out_f, in_f) bf16 (already transposed in the wrapper)
    #   b*_ref : (out_f, 1) f32   (broadcasts over the lane/batch axis)
    #   out_ref: (n_actions, TB) f32
    x = x_ref[...]

    # Layer 1: (32, in) @ (in, TB) -> (32, TB), f32 accumulation on the MXU.
    h1 = jnp.dot(w1_ref[...], x, preferred_element_type=jnp.float32)
    h1 = jnp.maximum(h1 + b1_ref[...], 0.0)

    # Layer 2: (16, 32) @ (32, TB) -> (16, TB)
    h2 = jnp.dot(w2_ref[...], h1.astype(jnp.bfloat16),
                 preferred_element_type=jnp.float32)
    h2 = jnp.maximum(h2 + b2_ref[...], 0.0)

    # Layer 3: (out, 16) @ (16, TB) -> (out, TB)
    logits = jnp.dot(w3_ref[...], h2.astype(jnp.bfloat16),
                     preferred_element_type=jnp.float32)
    logits = logits + b3_ref[...]

    # Softmax over the action axis, which is the sublane axis (axis 0) in this
    # transposed layout. Numerically stable; reciprocal goes to the EUP slot.
    m = jnp.max(logits, axis=0, keepdims=True)
    e = jnp.exp(logits - m)
    denom = jnp.sum(e, axis=0, keepdims=True)
    out_ref[...] = (e * pl.reciprocal(denom, approx=True)).astype(out_ref.dtype)


def policy_approximator_forward(state, params):
    """state: (B, input_shape) float32 -> (B, output_shape) action probabilities."""
    w1, b1, w2, b2, w3, b3 = params
    B, in_dim = state.shape
    out_dim = w3.shape[1]

    # --- batch tiling: lane-dense batch tiles, multiple of 128 ------------------
    LANE = 128
    MAX_TB = 512                               # fits trivially in VMEM on v5e/v6e/v7x
    b_pad = ((B + LANE - 1) // LANE) * LANE
    tb = min(MAX_TB, b_pad)
    b_pad = ((b_pad + tb - 1) // tb) * tb
    n_tiles = b_pad // tb

    # --- layout plumbing in the wrapper (XLA handles this) ----------------------
    x_t = jnp.pad(state, ((0, b_pad - B), (0, 0))).T.astype(jnp.bfloat16)  # (in, Bp)
    w1t = w1.T.astype(jnp.bfloat16)            # (32, in)
    w2t = w2.T.astype(jnp.bfloat16)            # (16, 32)
    w3t = w3.T.astype(jnp.bfloat16)            # (out, 16)
    b1c = b1.reshape(-1, 1).astype(jnp.float32)   # (32, 1)
    b2c = b2.reshape(-1, 1).astype(jnp.float32)   # (16, 1)
    b3c = b3.reshape(-1, 1).astype(jnp.float32)   # (out, 1)

    # --- scheduler hint ----------------------------------------------------------
    flops = 2 * b_pad * (in_dim * 32 + 32 * 16 + 16 * out_dim)
    transcendentals = b_pad * (out_dim + 1)            # exp + reciprocal
    bytes_accessed = (x_t.size * 2
                      + (w1t.size + w2t.size + w3t.size) * 2
                      + (b1c.size + b2c.size + b3c.size) * 4
                      + b_pad * out_dim * 4)
    cost = pl.CostEstimate(flops=flops, transcendentals=transcendentals,
                           bytes_accessed=bytes_accessed)

    out_t = pl.pallas_call(
        policy_mlp_kernel,
        out_shape=jax.ShapeDtypeStruct((out_dim, b_pad), jnp.float32),
        grid=(n_tiles,),
        in_specs=[
            pl.BlockSpec((in_dim, tb), lambda i: (0, i)),       # batch-tiled input
            pl.BlockSpec(w1t.shape, lambda i: (0, 0)),          # weights stay resident
            pl.BlockSpec(b1c.shape, lambda i: (0, 0)),
            pl.BlockSpec(w2t.shape, lambda i: (0, 0)),
            pl.BlockSpec(b2c.shape, lambda i: (0, 0)),
            pl.BlockSpec(w3t.shape, lambda i: (0, 0)),
            pl.BlockSpec(b3c.shape, lambda i: (0, 0)),
        ],
        out_specs=pl.BlockSpec((out_dim, tb), lambda i: (0, i)),
        compiler_params=pltpu.CompilerParams(
            dimension_semantics=("parallel",)),                 # 2 TCs on v7x
        cost_estimate=cost,
    )(x_t, w1t, b1c, w2t, b2c, w3t, b3c)

    # back to (B, out_dim), dropping batch padding
    return out_t.T[:B]


def reference_forward(state, params):
    """Pure-JAX f32 reference of the PyTorch forward pass."""
    w1, b1, w2, b2, w3, b3 = params
    h1 = jnp.maximum(state @ w1 + b1, 0.0)
    h2 = jnp.maximum(h1 @ w2 + b2, 0.0)
    logits = h2 @ w3 + b3
    return jax.nn.softmax(logits, axis=1)


def init_params(key, input_shape, output_shape):
    """Deterministic init mimicking PyTorch nn.Linear default (uniform +/- 1/sqrt(fan_in))."""
    dims = [(input_shape, 32), (32, 16), (16, output_shape)]
    params = []
    for (fan_in, fan_out) in dims:
        key, kw, kb = jax.random.split(key, 3)
        bound = 1.0 / jnp.sqrt(jnp.float32(fan_in))
        w = jax.random.uniform(kw, (fan_in, fan_out), jnp.float32, -bound, bound)
        b = jax.random.uniform(kb, (1, fan_out), jnp.float32, -bound, bound)
        params += [w, b]
    return tuple(params)


if __name__ == "__main__":
    key = jax.random.PRNGKey(0)
    key, k_state, k_big = jax.random.split(key, 3)

    input_shape = 8     # state feature dim
    output_shape = 4    # number of actions
    batch = 2

    params = init_params(key, input_shape, output_shape)

    # --- small test (spec-sized) -------------------------------------------------
    state = jax.random.normal(k_state, (batch, input_shape), jnp.float32)
    probs = jax.block_until_ready(policy_approximator_forward(state, params))
    ref = reference_forward(state, params)

    assert probs.shape == (batch, output_shape)
    row_sums = jnp.sum(probs, axis=1)
    # approx reciprocal + bf16 MXU -> generous but meaningful tolerances
    assert bool(jnp.all(jnp.abs(row_sums - 1.0) < 1e-2)), row_sums
    assert bool(jnp.max(jnp.abs(probs - ref)) < 5e-2)

    # --- multi-tile test (exercises the batch grid + padding/slicing path) -------
    big_batch = 600
    big_state = jax.random.normal(k_big, (big_batch, input_shape), jnp.float32)
    big_probs = jax.block_until_ready(policy_approximator_forward(big_state, params))
    big_ref = reference_forward(big_state, params)

    assert big_probs.shape == (big_batch, output_shape)
    assert bool(jnp.all(jnp.abs(jnp.sum(big_probs, axis=1) - 1.0) < 1e-2))
    assert bool(jnp.max(jnp.abs(big_probs - big_ref)) < 5e-2)

    print("KERNEL_OK")
</pallas_src>

<mosaic_0001>
module attributes {stable_mosaic.version = 11 : i64} {
  func.func @policy_mlp_kernel(%arg0: i32, %arg1: memref<8x128xbf16, #tpu.memory_space<vmem>>, %arg2: memref<32x8xbf16, #tpu.memory_space<vmem>>, %arg3: memref<32x1xf32, #tpu.memory_space<vmem>>, %arg4: memref<16x32xbf16, #tpu.memory_space<vmem>>, %arg5: memref<16x1xf32, #tpu.memory_space<vmem>>, %arg6: memref<4x16xbf16, #tpu.memory_space<vmem>>, %arg7: memref<4x1xf32, #tpu.memory_space<vmem>>, %arg8: memref<4x128xf32, #tpu.memory_space<vmem>>) attributes {dimension_semantics = [#tpu.dimension_semantics<parallel>], iteration_bounds = array<i64: 1>, scalar_prefetch = 0 : i64, scratch_operands = 0 : i64, tpu.core_type = #tpu.core_type<tc>, window_params = [{transform_indices = @transform_0, window_bounds = array<i64: 8, 128>}, {pipeline_mode = #tpu.pipeline_mode<synchronous>, transform_indices = @transform_1, window_bounds = array<i64: 32, 8>}, {pipeline_mode = #tpu.pipeline_mode<synchronous>, transform_indices = @transform_2, window_bounds = array<i64: 32, 1>}, {pipeline_mode = #tpu.pipeline_mode<synchronous>, transform_indices = @transform_3, window_bounds = array<i64: 16, 32>}, {pipeline_mode = #tpu.pipeline_mode<synchronous>, transform_indices = @transform_4, window_bounds = array<i64: 16, 1>}, {pipeline_mode = #tpu.pipeline_mode<synchronous>, transform_indices = @transform_5, window_bounds = array<i64: 4, 16>}, {pipeline_mode = #tpu.pipeline_mode<synchronous>, transform_indices = @transform_6, window_bounds = array<i64: 4, 1>}, {transform_indices = @transform_7, window_bounds = array<i64: 4, 128>}]} {
    %c0 = arith.constant 0 : index
    %c0_0 = arith.constant 0 : index
    %0 = vector.load %arg1[%c0, %c0_0] : memref<8x128xbf16, #tpu.memory_space<vmem>>, vector<8x128xbf16>
    %c0_1 = arith.constant 0 : index
    %c0_2 = arith.constant 0 : index
    %1 = vector.load %arg2[%c0_1, %c0_2] : memref<32x8xbf16, #tpu.memory_space<vmem>>, vector<32x8xbf16>
    %cst = arith.constant dense<0.000000e+00> : vector<32x128xf32>
    %2 = tpu.matmul %1, %0, %cst {dimension_numbers = #tpu.dot_dimension_numbers<[1], [0], [0], [1], [0, 0, 1, 1], [], []>} : vector<32x8xbf16>, vector<8x128xbf16>, vector<32x128xf32> -> vector<32x128xf32>
    %c0_3 = arith.constant 0 : index
    %c0_4 = arith.constant 0 : index
    %3 = vector.load %arg3[%c0_3, %c0_4] : memref<32x1xf32, #tpu.memory_space<vmem>>, vector<32x1xf32>
    %4 = vector.broadcast %3 : vector<32x1xf32> to vector<32x128xf32>
    %5 = arith.addf %2, %4 : vector<32x128xf32>
    %cst_5 = arith.constant 0.000000e+00 : f32
    %6 = vector.broadcast %cst_5 : f32 to vector<32x128xf32>
    %7 = arith.maximumf %5, %6 : vector<32x128xf32>
    %c0_6 = arith.constant 0 : index
    %c0_7 = arith.constant 0 : index
    %8 = vector.load %arg4[%c0_6, %c0_7] : memref<16x32xbf16, #tpu.memory_space<vmem>>, vector<16x32xbf16>
    %9 = arith.truncf %7 : vector<32x128xf32> to vector<32x128xbf16>
    %cst_8 = arith.constant dense<0.000000e+00> : vector<16x128xf32>
    %10 = tpu.matmul %8, %9, %cst_8 {dimension_numbers = #tpu.dot_dimension_numbers<[1], [0], [0], [1], [0, 0, 1, 1], [], []>} : vector<16x32xbf16>, vector<32x128xbf16>, vector<16x128xf32> -> vector<16x128xf32>
    %c0_9 = arith.constant 0 : index
    %c0_10 = arith.constant 0 : index
    %11 = vector.load %arg5[%c0_9, %c0_10] : memref<16x1xf32, #tpu.memory_space<vmem>>, vector<16x1xf32>
    %12 = vector.broadcast %11 : vector<16x1xf32> to vector<16x128xf32>
    %13 = arith.addf %10, %12 : vector<16x128xf32>
    %cst_11 = arith.constant 0.000000e+00 : f32
    %14 = vector.broadcast %cst_11 : f32 to vector<16x128xf32>
    %15 = arith.maximumf %13, %14 : vector<16x128xf32>
    %c0_12 = arith.constant 0 : index
    %c0_13 = arith.constant 0 : index
    %16 = vector.load %arg6[%c0_12, %c0_13] : memref<4x16xbf16, #tpu.memory_space<vmem>>, vector<4x16xbf16>
    %17 = arith.truncf %15 : vector<16x128xf32> to vector<16x128xbf16>
    %cst_14 = arith.constant dense<0.000000e+00> : vector<4x128xf32>
    %18 = tpu.matmul %16, %17, %cst_14 {dimension_numbers = #tpu.dot_dimension_numbers<[1], [0], [0], [1], [0, 0, 1, 1], [], []>} : vector<4x16xbf16>, vector<16x128xbf16>, vector<4x128xf32> -> vector<4x128xf32>
    %c0_15 = arith.constant 0 : index
    %c0_16 = arith.constant 0 : index
    %19 = vector.load %arg7[%c0_15, %c0_16] : memref<4x1xf32, #tpu.memory_space<vmem>>, vector<4x1xf32>
    %20 = vector.broadcast %19 : vector<4x1xf32> to vector<4x128xf32>
    %21 = arith.addf %18, %20 : vector<4x128xf32>
    %cst_17 = arith.constant dense<0xFF800000> : vector<128xf32>
    %22 = vector.multi_reduction <maximumf>, %21, %cst_17 [0] : vector<4x128xf32> to vector<128xf32>
    %23 = vector.shape_cast %22 : vector<128xf32> to vector<1x128xf32>
    %24 = vector.broadcast %23 : vector<1x128xf32> to vector<4x128xf32>
    %25 = arith.subf %21, %24 : vector<4x128xf32>
    %26 = math.exp %25 : vector<4x128xf32>
    %cst_18 = arith.constant dense<0.000000e+00> : vector<128xf32>
    %27 = vector.multi_reduction <add>, %26, %cst_18 [0] : vector<4x128xf32> to vector<128xf32>
    %28 = vector.shape_cast %27 : vector<128xf32> to vector<1x128xf32>
    %29 = tpu.reciprocal %28 {approx = true} : vector<1x128xf32> -> vector<1x128xf32>
    %30 = vector.broadcast %29 : vector<1x128xf32> to vector<4x128xf32>
    %31 = arith.mulf %26, %30 : vector<4x128xf32>
    %c0_19 = arith.constant 0 : index
    %c0_20 = arith.constant 0 : index
    %32 = vector.load %arg8[%c0_19, %c0_20] : memref<4x128xf32, #tpu.memory_space<vmem>>, vector<4x128xf32>
    tpu.vector_store %arg8[%c0_19, %c0_20], %31 {strides = array<i32>} : memref<4x128xf32, #tpu.memory_space<vmem>>, vector<4x128xf32>,
    return
  }
  func.func @transform_0(%arg0: i32) -> (i32, i32) {
    %c0_i32 = arith.constant 0 : i32
    %c0_i32_0 = arith.constant 0 : i32
    return %c0_i32, %arg0 : i32, i32
  }
  func.func @transform_1(%arg0: i32) -> (i32, i32) {
    %c0_i32 = arith.constant 0 : i32
    %c0_i32_0 = arith.constant 0 : i32
    %c0_i32_1 = arith.constant 0 : i32
    return %c0_i32, %c0_i32_0 : i32, i32
  }
  func.func @transform_2(%arg0: i32) -> (i32, i32) {
    %c0_i32 = arith.constant 0 : i32
    %c0_i32_0 = arith.constant 0 : i32
    %c0_i32_1 = arith.constant 0 : i32
    return %c0_i32, %c0_i32_0 : i32, i32
  }
  func.func @transform_3(%arg0: i32) -> (i32, i32) {
    %c0_i32 = arith.constant 0 : i32
    %c0_i32_0 = arith.constant 0 : i32
    %c0_i32_1 = arith.constant 0 : i32
    return %c0_i32, %c0_i32_0 : i32, i32
  }
  func.func @transform_4(%arg0: i32) -> (i32, i32) {
    %c0_i32 = arith.constant 0 : i32
    %c0_i32_0 = arith.constant 0 : i32
    %c0_i32_1 = arith.constant 0 : i32
    return %c0_i32, %c0_i32_0 : i32, i32
  }
  func.func @transform_5(%arg0: i32) -> (i32, i32) {
    %c0_i32 = arith.constant 0 : i32
    %c0_i32_0 = arith.constant 0 : i32
    %c0_i32_1 = arith.constant 0 : i32
    return %c0_i32, %c0_i32_0 : i32, i32
  }
  func.func @transform_6(%arg0: i32) -> (i32, i32) {
    %c0_i32 = arith.constant 0 : i32
    %c0_i32_0 = arith.constant 0 : i32
    %c0_i32_1 = arith.constant 0 : i32
    return %c0_i32, %c0_i32_0 : i32, i32
  }
  func.func @transform_7(%arg0: i32) -> (i32, i32) {
    %c0_i32 = arith.constant 0 : i32
    %c0_i32_0 = arith.constant 0 : i32
    return %c0_i32, %arg0 : i32, i32
  }
}

</mosaic_0001>

<bundles_post_ra>
// kernel: tpu_custom_call.1
= control target key start
LH: loop header
LB: loop body
LE: loop exit
PB: predicated region body
PF: predicated region fallthrough
CT: control target
= control target key end

     0   :  { %vm74_vm0 = vcmask 1043456   ;;  %vm67_vm1 = vcmask 64512   ;;  %v356_v5 = vmov 0   ;;  %s443_s0 = inlined_call_operand.vmem [shape: bf16[8,128], index: 0, kind: input, shape index: {}]   ;;  %s444_s1 = inlined_call_operand.vmem [shape: bf16[32,8], index: 1, kind: input, shape index: {}]   ;;  %s445_s2 = inlined_call_operand.vmem [shape: f32[32,1], index: 2, kind: input, shape index: {}]   ;;  %s446_s3 = inlined_call_operand.vmem [shape: bf16[16,32], index: 3, kind: input, shape index: {}]   ;;  %s447_s4 = inlined_call_operand.vmem [shape: f32[16,1], index: 4, kind: input, shape index: {}]   ;;  %s448_s5 = inlined_call_operand.vmem [shape: bf16[4,16], index: 5, kind: input, shape index: {}]   ;;  %s449_s6 = inlined_call_operand.vmem [shape: f32[4,1], index: 6, kind: input, shape index: {}]   ;;  %s450_s7 = inlined_call_operand.hbm [shape: f32[4,128], index: 7, kind: output, shape index: {}]  }
   0x1   :  { %v28_v0 = vld [vmem:[%s443_s0] sm:$0xf]  ;;  %v328_v3 = vld [vmem:[%s444_s1 + $0x8] sm:$0xff]   ;;  %v35_v4 = vld [vmem:[%s445_s2 + $0x10] sm:$0xff]  ;;  %325 = vset.pattern.permute.xlu0 %v356_v5  ;;  %326 = vset.pattern.permute.xlu1 %v356_v5 }
   0x2   :  { %v327_v1 = vld [vmem:[%s444_s1] sm:$0xff]   ;;  %320 = vmatprep.subr.msk.bf16.mxu0 %vm74_vm0, %v28_v0  ;;  %v76_v2 = vsel %vm74_vm0, %v28_v0, 0  ;;  %49 = vperm.xlu0 %325, %v35_v4   ;;  %v36_v7 = vld [vmem:[%s445_s2 + $0x18] sm:$0xff]  ;;  %v34_v8 = vld [vmem:[%s445_s2 + $0x8] sm:$0xff] }
   0x3   :  { %301 = vmatpush3.bf16.msra.mxu0 %v76_v2  ;;  %302 = vmatprep.mubr.msk.bf16.mxu0 %vm67_vm1, %v327_v1  ;;  %v33_v6 = vld [vmem:[%s445_s2] sm:$0xff] }
   0x4   :  { %39 = vperm.xlu1 %326, %v33_v6  }
   0x6   :  { %303 = vmatmul.mubr.msk.bf16.vlgmr.msra.gmra.mxu0 %vm67_vm1, %v328_v3 }
   0x7   :  { %12 = vsyncpa [#allocation3], 0  ;;  %54 = vperm.xlu0 %325, %v36_v7   ;;  %v135_v9 = vld [vmem:[%s447_s4] sm:$0xff]  ;;  %v136_v10 = vld [vmem:[%s447_s4 + $0x8] sm:$0xff]  ;;  %v357_v12 = vmov 0.0   ;;  %vm358_vm2 = vmmov 0  }
   0x8   :  { %44 = vperm.xlu1 %326, %v34_v8   ;;  %v201_v11 = vld [vmem:[%s449_s6] sm:$0xf]  ;;  %306 = vmatprep.subr.bf16.mxu1 %v357_v12  ;;  %vm152_vm3 = vcmask 261120   ;;  %vm207_vm4 = vcmask 130048  }
   0x9   :  { %314 = vmatprep.subr.bf16.mxu0 %v357_v12  ;;  %310 = vmatprep.mubr.msk.bf16.mxu1 %vm358_vm2, %v357_v12  ;;  %v329_v31 = vld [vmem:[%s446_s3] sm:$0xff]   ;;  %s359_s3 = smov [#allocation2]  }
   0xa   :  { %316 = vmatprep.mubr.msk.bf16.mxu0 %vm358_vm2, %v357_v12  ;;  %v199_v43 = vld [vmem:[%s448_s5] sm:$0x3]  ;;  %s277_s5 = sshll.u32 %s359_s3, 4  ;;  %s278_s5 = int_to_ptr.vmem [resolvable:$true] %s277_s5 }
   0xb   :  { %139 = vperm.xlu0 %325, %v135_v9   ;;  %s334_s20 = scalar_lea.vmem %s278_s5, 64  ;;  %p339_p1 = scmp.lt.s32.totalorder %s278_s5, %s278_s5 }
   0xc   :  { %144 = vperm.xlu1 %326, %v136_v10   ;;  %p335_p0 = scmp.ne.s32.totalorder %s278_s5, %s334_s20  ;;  %p340_p2 = scmp.lt.s32.totalorder %s334_s20, %s334_s20 }
   0xe   :  { %p341_p3 = por %p340_p2, %p339_p1 }
   0xf   :  { %204 = vperm.xlu0 %325, %v201_v11  }
  0x10   :  { %p342_p4 = pnand %p341_p3, %p335_p0 }
  0x7d   :  { %v50_v13 = vpop.permute.xlu0 %49 }
  0x7f   :  { %v40_v14 = vpop.permute.xlu1 %39 }
  0x82   :  { %v55_v18 = vpop.permute.xlu0 %54 }
  0x83   :  { %v45_v21 = vpop.permute.xlu1 %44 }
  0x86   :  { %v140_v33 = vpop.permute.xlu0 %139 }
  0x87   :  { %v145_v36 = vpop.permute.xlu1 %144 }
  0x8a   :  { %v205_v44 = vpop.permute.xlu0 %204 }
  0xc6   :  { %v304_v15 = vpop.f32.mrf.mxu0 }
  0xc7   :  { %v121_v17 = vadd.f32 %v304_v15, %v50_v13 }
  0xc8   :  { %v112_v16 = vpop.f32.mrf.mxu0 }
  0xc9   :  { %v129_v23 = vmax.f32 %v121_v17, 0.0  ;;  %v113_v24 = vadd.f32 %v112_v16, %v40_v14 }
  0xca   :  { %v305_v19 = vpop.f32.mrf.mxu0 }
  0xcb   :  { %v124_v20 = vadd.f32 %v305_v19, %v55_v18  ;;  %v127_v29 = vmax.f32 %v113_v24, 0.0 }
  0xcc   :  { %v115_v22 = vpop.f32.mrf.mxu0 }
  0xcd   :  { %v130_v25 = vmax.f32 %v124_v20, 0.0  ;;  %v116_v26 = vadd.f32 %v115_v22, %v45_v21 }
  0xcf   :  { %v128_v27 = vmax.f32 %v116_v26, 0.0  ;;  %v134_v28 = vpack.c.bf16 %v130_v25, %v129_v23 }
  0xd1   :  { %307 = vmatpush3.bf16.msra.mxu1 %v134_v28  ;;  %v133_v30 = vpack.c.bf16 %v128_v27, %v127_v29 }
  0xd2   :  { %308 = vmatprep.subr.bf16.mxu1 %v357_v12 }
  0xd5   :  { %309 = vmatpush3.bf16.msra.mxu1 %v133_v30 }
  0xd8   :  { %311 = vmatmul.mubr.msk.bf16.vlgmr.msra.gmra.mxu1 %vm152_vm3, %v329_v31 }
 0x198   :  { %v190_v32 = vpop.f32.mrf.mxu1 }
 0x199   :  { %v191_v35 = vadd.f32 %v190_v32, %v140_v33 }
 0x19a   :  { %v312_v34 = vpop.f32.mrf.mxu1 }
 0x19b   :  { %v197_v40 = vmax.f32 %v191_v35, 0.0 }
 0x19c   :  { %v193_v37 = vpop.f32.mrf.mxu1 }
 0x19d   :  { %v194_v38 = vadd.f32 %v193_v37, %v145_v36 }
 0x19e   :  { %v313_v39 = vpop.f32.mrf.mxu1 }
 0x19f   :  { %v198_v41 = vmax.f32 %v194_v38, 0.0 }
 0x1a1   :  { %v200_v42 = vpack.c.bf16 %v198_v41, %v197_v40 }
 0x1a3   :  { %315 = vmatpush3.bf16.msra.mxu0 %v200_v42 }
 0x1a6   :  { %317 = vmatmul.mubr.msk.bf16.vlgmr.msra.gmra.mxu0 %vm207_vm4, %v199_v43 }
 0x266   :  { %v245_v45 = vpop.f32.mrf.mxu0 }
 0x267   :  { %v246_v46 = vadd.f32 %v245_v45, %v205_v44 }
 0x268   :  { %v318_v47 = vpop.f32.mrf.mxu0 }
 0x269   :  { %v251_v48 = vsel %vm74_vm0, %v246_v46, -inf }
 0x26a   :  { %v252_v49 = vrot.slane %v251_v48, 4  ;;  %v248_v50 = vpop.f32.mrf.mxu0 }
 0x26c   :  { %v253_v51 = vmax.f32 %v251_v48, %v252_v49  ;;  %v319_v52 = vpop.f32.mrf.mxu0 }
 0x26e   :  { %v254_v53 = vrot.slane %v253_v51, 2 }
 0x270   :  { %v255_v54 = vmax.f32 %v253_v51, %v254_v53 }
 0x272   :  { %v256_v55 = vrot.slane %v255_v54, 1 }
 0x274   :  { %v257_v56 = vmax.f32 %v255_v54, %v256_v55 }
 0x276   :  { %v258_v57 = vsub.f32 %v246_v46, %v257_v56 }
 0x278   :  { %v259_v58 = vmul.f32 1.442695, %v258_v57 }
 0x27a   :  { %330 = vpow2.f32 %v259_v58 }
 0x287   :  { %v331_v59 = vpop.eup %330 }
 0x288   :  { %v261_v60 = vsel %vm74_vm0, %v331_v59, 0.0 }
 0x289   :  { %v262_v61 = vrot.slane %v261_v60, 4 }
 0x28b   :  { %v263_v62 = vadd.f32 %v262_v61, %v261_v60 }
 0x28d   :  { %v264_v63 = vrot.slane %v263_v62, 2 }
 0x28f   :  { %v265_v0 = vadd.f32 %v264_v63, %v263_v62 }
 0x291   :  { %v266_v1 = vrot.slane %v265_v0, 1 }
 0x293   :  { %v267_v2 = vadd.f32 %v266_v1, %v265_v0 }
 0x295   :  { %332 = vrcp.f32 %v267_v2 }
 0x2a2   :  { %v333_v3 = vpop.eup %332 }
 0x2a3   :  { %v269_v4 = vmul.f32 %v333_v3, %v331_v59 }
 0x2a5   :  { %270 = vst [vmem:[#allocation2] sm:$0xf] %v269_v4 }
 0x2a6   :  { %345 = shalt.err (!%p342_p4)
}
 0x2a7   :  { %280 = dma.vmem_to_hbm [thread:$0]  %s278_s5, 64, %s450_s7, [#allocation3]  }
 0x2a8   :  { %354 = dma.done.wait [#allocation3], 64  }
 0x2a9   :  { %355 = vsyncadd [#allocation3], 4294967232 }
 0x2aa   :  { %284 = vsyncpa [#allocation3], 1 }

</bundles_post_ra>
